<compile_context>
chip_gen: v5e
topology: v5e:2x2
jax: 0.10.0
libtpu: 0.0.40
codegen_flags: <defaults>
</compile_context>

<pallas_src>
import jax
import jax.numpy as jnp
from jax.experimental import pallas as pl
from jax.experimental.pallas import tpu as pltpu


def _round_up(a, b):
    return (a + b - 1) // b * b


def _kernel_shortcut(x_ref, w0_ref, b0_ref, w1_ref, b1_ref, ws_ref, o_ref):
    x = x_ref[...]                                            # (tm, size_in) f32
    h0 = jnp.maximum(x, 0.0).astype(jnp.bfloat16)             # relu in f32, cast at MXU boundary
    net = jnp.dot(h0, w0_ref[...], preferred_element_type=jnp.float32) + b0_ref[...]
    h1 = jnp.maximum(net, 0.0).astype(jnp.bfloat16)
    dx = jnp.dot(h1, w1_ref[...], preferred_element_type=jnp.float32) + b1_ref[...]
    x_s = jnp.dot(x.astype(jnp.bfloat16), ws_ref[...], preferred_element_type=jnp.float32)
    o_ref[...] = (x_s + dx).astype(o_ref.dtype)


def _kernel_identity(x_ref, w0_ref, b0_ref, w1_ref, b1_ref, o_ref):
    # size_in == size_out: identity shortcut, no ws matmul (matches PyTorch).
    x = x_ref[...]                                            # (tm, size_p) f32, lane-padded
    h0 = jnp.maximum(x, 0.0).astype(jnp.bfloat16)
    net = jnp.dot(h0, w0_ref[...], preferred_element_type=jnp.float32) + b0_ref[...]
    h1 = jnp.maximum(net, 0.0).astype(jnp.bfloat16)
    dx = jnp.dot(h1, w1_ref[...], preferred_element_type=jnp.float32) + b1_ref[...]
    o_ref[...] = (x + dx).astype(o_ref.dtype)


def resnet_block_fc(x, w0, b0, w1, b1, ws=None, *, tm=1024):
    """ResnetBlockFC forward.

    x  : (N, size_in) float32
    w0 : (size_in, size_h)   fc_0 weight (pre-transposed: y = x @ W + b)
    b0 : (size_h,)
    w1 : (size_h, size_out)  fc_1 weight (pre-transposed)
    b1 : (size_out,)
    ws : (size_in, size_out) shortcut weight (pre-transposed), or None when
         size_in == size_out (identity shortcut).
    Returns (N, size_out) float32.
    """
    N, size_in = x.shape
    size_h = w0.shape[1]
    size_out = w1.shape[1]
    has_shortcut = ws is not None
    if not has_shortcut and size_in != size_out:
        raise ValueError("ws must be provided when size_in != size_out")

    # Lane-dense padded widths (multiples of 128). Zero padding is exact:
    # padded hidden columns are relu(0 + 0) = 0 and hit zero rows of w1;
    # padded output columns (0 bias, 0 weight cols) are sliced off.
    size_h_p = _round_up(size_h, 128)
    size_out_p = _round_up(size_out, 128)
    # Identity path: the residual add needs x in the same padded lane layout
    # as the output, so pad the x feature dim too (zero cols -> exact).
    size_in_k = size_in if has_shortcut else size_out_p

    # Row tile: large (amortizes ~0.35us per grid step) but clamped so the
    # grid keeps at least 2 steps for v7x's two TensorCores.
    tm_eff = max(8, min(tm, _round_up((N + 1) // 2, 8)))
    n_pad = _round_up(N, tm_eff)
    grid = (n_pad // tm_eff,)

    f32, bf16 = jnp.float32, jnp.bfloat16

    def pad2(a, rows, cols, dtype):
        out = jnp.zeros((rows, cols), dtype)
        return out.at[: a.shape[0], : a.shape[1]].set(a.astype(dtype))

    x_p = pad2(x, n_pad, size_in_k, x.dtype)                  # activations stay f32
    w0_p = pad2(w0, size_in_k, size_h_p, bf16)                # bf16 weights: MXU-native, half HBM
    w1_p = pad2(w1, size_h_p, size_out_p, bf16)
    b0_p = pad2(b0.reshape(1, -1), 1, size_h_p, f32)          # biases stay f32 (VPU add)
    b1_p = pad2(b1.reshape(1, -1), 1, size_out_p, f32)

    x_spec = pl.BlockSpec((tm_eff, size_in_k), lambda i: (i, 0))
    w0_spec = pl.BlockSpec((size_in_k, size_h_p), lambda i: (0, 0))
    b0_spec = pl.BlockSpec((1, size_h_p), lambda i: (0, 0))
    w1_spec = pl.BlockSpec((size_h_p, size_out_p), lambda i: (0, 0))
    b1_spec = pl.BlockSpec((1, size_out_p), lambda i: (0, 0))
    out_spec = pl.BlockSpec((tm_eff, size_out_p), lambda i: (i, 0))

    if has_shortcut:
        ws_p = pad2(ws, size_in_k, size_out_p, bf16)
        ws_spec = pl.BlockSpec((size_in_k, size_out_p), lambda i: (0, 0))
        kernel = _kernel_shortcut
        in_specs = [x_spec, w0_spec, b0_spec, w1_spec, b1_spec, ws_spec]
        args = (x_p, w0_p, b0_p, w1_p, b1_p, ws_p)
    else:
        kernel = _kernel_identity
        in_specs = [x_spec, w0_spec, b0_spec, w1_spec, b1_spec]
        args = (x_p, w0_p, b0_p, w1_p, b1_p)

    out_p = pl.pallas_call(
        kernel,
        out_shape=jax.ShapeDtypeStruct((n_pad, size_out_p), x.dtype),
        grid_spec=pltpu.PrefetchScalarGridSpec(
            num_scalar_prefetch=0,
            grid=grid,
            in_specs=in_specs,
            out_specs=out_spec,
        ),
        compiler_params=pltpu.CompilerParams(
            dimension_semantics=("parallel",)),
    )(*args)

    return out_p[:N, :size_out]


def init_params(key, size_in, size_out=None, size_h=None):
    """Synthetic params mirroring ResnetBlockFC.__init__ shapes (pre-transposed).

    NOTE: PyTorch zero-inits fc_1.weight; we use small random values so the
    numerical check actually exercises the second matmul (forward semantics
    are identical for arbitrary trained weights).
    """
    if size_out is None:
        size_out = size_in
    if size_h is None:
        size_h = min(size_in, size_out)
    k0, k1, k2, k3, k4 = jax.random.split(key, 5)
    w0 = jax.random.normal(k0, (size_in, size_h), jnp.float32) * 0.1
    b0 = jax.random.normal(k1, (size_h,), jnp.float32) * 0.1
    w1 = jax.random.normal(k2, (size_h, size_out), jnp.float32) * 0.1
    b1 = jax.random.normal(k3, (size_out,), jnp.float32) * 0.1
    ws = None
    if size_in != size_out:
        ws = jax.random.normal(k4, (size_in, size_out), jnp.float32) * 0.1
    return w0, b0, w1, b1, ws


def reference(x, w0, b0, w1, b1, ws):
    net = jnp.maximum(x, 0.0) @ w0 + b0
    dx = jnp.maximum(net, 0.0) @ w1 + b1
    x_s = x if ws is None else x @ ws
    return x_s + dx


if __name__ == "__main__":
    key = jax.random.PRNGKey(0)
    kx1, kp1, kx2, kp2 = jax.random.split(key, 4)

    # Case 1: size_in != size_out -> learned (bias-free) shortcut matmul.
    size_in, size_out = 32, 64           # size_h = min(size_in, size_out) = 32
    N = 200                              # not a multiple of the tile -> exercises row padding
    x = jax.random.normal(kx1, (N, size_in), jnp.float32)
    w0, b0, w1, b1, ws = init_params(kp1, size_in, size_out)
    out = jax.block_until_ready(resnet_block_fc(x, w0, b0, w1, b1, ws))
    ref = reference(x, w0, b0, w1, b1, ws)
    assert out.shape == (N, size_out)
    # bf16 MXU operands (f32 accumulation) -> loosened tolerance vs. pure-f32 reference.
    assert jnp.allclose(out, ref, atol=5e-2, rtol=5e-2), float(jnp.max(jnp.abs(out - ref)))

    # Case 2: size_in == size_out -> identity shortcut (no ws matmul).
    size_in2 = size_out2 = 32
    N2 = 136
    x2 = jax.random.normal(kx2, (N2, size_in2), jnp.float32)
    w0b, b0b, w1b, b1b, _ = init_params(kp2, size_in2, size_out2)
    out2 = jax.block_until_ready(resnet_block_fc(x2, w0b, b0b, w1b, b1b, None))
    ref2 = reference(x2, w0b, b0b, w1b, b1b, None)
    assert out2.shape == (N2, size_out2)
    assert jnp.allclose(out2, ref2, atol=5e-2, rtol=5e-2), float(jnp.max(jnp.abs(out2 - ref2)))

    print("KERNEL_OK")
</pallas_src>

<mosaic_0001>
module attributes {stable_mosaic.version = 11 : i64} {
  func.func @_kernel_shortcut(%arg0: i32, %arg1: memref<104x32xf32, #tpu.memory_space<vmem>>, %arg2: memref<32x128xbf16, #tpu.memory_space<vmem>>, %arg3: memref<1x128xf32, #tpu.memory_space<vmem>>, %arg4: memref<128x128xbf16, #tpu.memory_space<vmem>>, %arg5: memref<1x128xf32, #tpu.memory_space<vmem>>, %arg6: memref<32x128xbf16, #tpu.memory_space<vmem>>, %arg7: memref<104x128xf32, #tpu.memory_space<vmem>>) attributes {dimension_semantics = [#tpu.dimension_semantics<parallel>], iteration_bounds = array<i64: 2>, scalar_prefetch = 0 : i64, scratch_operands = 0 : i64, tpu.core_type = #tpu.core_type<tc>, window_params = [{transform_indices = @transform_0, window_bounds = array<i64: 104, 32>}, {pipeline_mode = #tpu.pipeline_mode<synchronous>, transform_indices = @transform_1, window_bounds = array<i64: 32, 128>}, {pipeline_mode = #tpu.pipeline_mode<synchronous>, transform_indices = @transform_2, window_bounds = array<i64: 1, 128>}, {pipeline_mode = #tpu.pipeline_mode<synchronous>, transform_indices = @transform_3, window_bounds = array<i64: 128, 128>}, {pipeline_mode = #tpu.pipeline_mode<synchronous>, transform_indices = @transform_4, window_bounds = array<i64: 1, 128>}, {pipeline_mode = #tpu.pipeline_mode<synchronous>, transform_indices = @transform_5, window_bounds = array<i64: 32, 128>}, {transform_indices = @transform_6, window_bounds = array<i64: 104, 128>}]} {
    %c0 = arith.constant 0 : index
    %c0_0 = arith.constant 0 : index
    %0 = vector.load %arg1[%c0, %c0_0] : memref<104x32xf32, #tpu.memory_space<vmem>>, vector<104x32xf32>
    %cst = arith.constant 0.000000e+00 : f32
    %1 = vector.broadcast %cst : f32 to vector<104x32xf32>
    %2 = arith.maximumf %0, %1 : vector<104x32xf32>
    %3 = arith.truncf %2 : vector<104x32xf32> to vector<104x32xbf16>
    %c0_1 = arith.constant 0 : index
    %c0_2 = arith.constant 0 : index
    %4 = vector.load %arg2[%c0_1, %c0_2] : memref<32x128xbf16, #tpu.memory_space<vmem>>, vector<32x128xbf16>
    %cst_3 = arith.constant dense<0.000000e+00> : vector<104x128xf32>
    %5 = tpu.matmul %3, %4, %cst_3 {dimension_numbers = #tpu.dot_dimension_numbers<[1], [0], [0], [1], [0, 0, 1, 1], [], []>} : vector<104x32xbf16>, vector<32x128xbf16>, vector<104x128xf32> -> vector<104x128xf32>
    %c0_4 = arith.constant 0 : index
    %c0_5 = arith.constant 0 : index
    %6 = vector.load %arg3[%c0_4, %c0_5] : memref<1x128xf32, #tpu.memory_space<vmem>>, vector<1x128xf32>
    %7 = vector.broadcast %6 : vector<1x128xf32> to vector<104x128xf32>
    %8 = arith.addf %5, %7 : vector<104x128xf32>
    %cst_6 = arith.constant 0.000000e+00 : f32
    %9 = vector.broadcast %cst_6 : f32 to vector<104x128xf32>
    %10 = arith.maximumf %8, %9 : vector<104x128xf32>
    %11 = arith.truncf %10 : vector<104x128xf32> to vector<104x128xbf16>
    %c0_7 = arith.constant 0 : index
    %c0_8 = arith.constant 0 : index
    %12 = vector.load %arg4[%c0_7, %c0_8] : memref<128x128xbf16, #tpu.memory_space<vmem>>, vector<128x128xbf16>
    %cst_9 = arith.constant dense<0.000000e+00> : vector<104x128xf32>
    %13 = tpu.matmul %11, %12, %cst_9 {dimension_numbers = #tpu.dot_dimension_numbers<[1], [0], [0], [1], [0, 0, 1, 1], [], []>} : vector<104x128xbf16>, vector<128x128xbf16>, vector<104x128xf32> -> vector<104x128xf32>
    %c0_10 = arith.constant 0 : index
    %c0_11 = arith.constant 0 : index
    %14 = vector.load %arg5[%c0_10, %c0_11] : memref<1x128xf32, #tpu.memory_space<vmem>>, vector<1x128xf32>
    %15 = vector.broadcast %14 : vector<1x128xf32> to vector<104x128xf32>
    %16 = arith.addf %13, %15 : vector<104x128xf32>
    %17 = arith.truncf %0 : vector<104x32xf32> to vector<104x32xbf16>
    %c0_12 = arith.constant 0 : index
    %c0_13 = arith.constant 0 : index
    %18 = vector.load %arg6[%c0_12, %c0_13] : memref<32x128xbf16, #tpu.memory_space<vmem>>, vector<32x128xbf16>
    %cst_14 = arith.constant dense<0.000000e+00> : vector<104x128xf32>
    %19 = tpu.matmul %17, %18, %cst_14 {dimension_numbers = #tpu.dot_dimension_numbers<[1], [0], [0], [1], [0, 0, 1, 1], [], []>} : vector<104x32xbf16>, vector<32x128xbf16>, vector<104x128xf32> -> vector<104x128xf32>
    %20 = arith.addf %19, %16 : vector<104x128xf32>
    %c0_15 = arith.constant 0 : index
    %c0_16 = arith.constant 0 : index
    %21 = vector.load %arg7[%c0_15, %c0_16] : memref<104x128xf32, #tpu.memory_space<vmem>>, vector<104x128xf32>
    tpu.vector_store %arg7[%c0_15, %c0_16], %20 {strides = array<i32>} : memref<104x128xf32, #tpu.memory_space<vmem>>, vector<104x128xf32>,
    return
  }
  func.func @transform_0(%arg0: i32) -> (i32, i32) {
    %c0_i32 = arith.constant 0 : i32
    %c0_i32_0 = arith.constant 0 : i32
    return %arg0, %c0_i32 : i32, i32
  }
  func.func @transform_1(%arg0: i32) -> (i32, i32) {
    %c0_i32 = arith.constant 0 : i32
    %c0_i32_0 = arith.constant 0 : i32
    %c0_i32_1 = arith.constant 0 : i32
    return %c0_i32, %c0_i32_0 : i32, i32
  }
  func.func @transform_2(%arg0: i32) -> (i32, i32) {
    %c0_i32 = arith.constant 0 : i32
    %c0_i32_0 = arith.constant 0 : i32
    %c0_i32_1 = arith.constant 0 : i32
    return %c0_i32, %c0_i32_0 : i32, i32
  }
  func.func @transform_3(%arg0: i32) -> (i32, i32) {
    %c0_i32 = arith.constant 0 : i32
    %c0_i32_0 = arith.constant 0 : i32
    %c0_i32_1 = arith.constant 0 : i32
    return %c0_i32, %c0_i32_0 : i32, i32
  }
  func.func @transform_4(%arg0: i32) -> (i32, i32) {
    %c0_i32 = arith.constant 0 : i32
    %c0_i32_0 = arith.constant 0 : i32
    %c0_i32_1 = arith.constant 0 : i32
    return %c0_i32, %c0_i32_0 : i32, i32
  }
  func.func @transform_5(%arg0: i32) -> (i32, i32) {
    %c0_i32 = arith.constant 0 : i32
    %c0_i32_0 = arith.constant 0 : i32
    %c0_i32_1 = arith.constant 0 : i32
    return %c0_i32, %c0_i32_0 : i32, i32
  }
  func.func @transform_6(%arg0: i32) -> (i32, i32) {
    %c0_i32 = arith.constant 0 : i32
    %c0_i32_0 = arith.constant 0 : i32
    return %arg0, %c0_i32 : i32, i32
  }
}

</mosaic_0001>

<bundles_post_ra>
// kernel: tpu_custom_call.1
= control target key start
LH: loop header
LB: loop body
LE: loop exit
PB: predicated region body
PF: predicated region fallthrough
CT: control target
= control target key end

     0   :  { %11 = vsyncpa [#allocation3], 0  ;;  %s1160_s0 = inlined_call_operand.vmem [shape: f32[208,32], index: 0, kind: input, shape index: {}]   ;;  %s1161_s1 = inlined_call_operand.vmem [shape: bf16[32,128], index: 1, kind: input, shape index: {}]   ;;  %s1162_s2 = inlined_call_operand.vmem [shape: f32[1,128], index: 2, kind: input, shape index: {}]   ;;  %s1163_s3 = inlined_call_operand.vmem [shape: bf16[128,128], index: 3, kind: input, shape index: {}]   ;;  %s1164_s4 = inlined_call_operand.vmem [shape: f32[1,128], index: 4, kind: input, shape index: {}]   ;;  %s1165_s5 = inlined_call_operand.vmem [shape: bf16[32,128], index: 5, kind: input, shape index: {}]   ;;  %s1166_s6 = inlined_call_operand.hbm [shape: f32[208,128], index: 6, kind: output, shape index: {}]  }
   0x1   :  { %13 = vsyncpa [#allocation3 + $0x1], 0  ;;  %s917_s21 = smov 0   ;;  %s919_s22 = smov 0  }
   0x2   :  { %s921_s23 = smov 0   ;;  %s923_s24 = smov 0  }
   0x3 LB: > { %s938_s25 = sadd.s32 4294967295, %s878_s24   ;;  %s681_s26 = sadd.s32 4294967294, %s878_s24   ;;  %s878_s24 = sphi %s923_s24, %s1172_s24   ;;  %s874_s23 = sphi %s921_s23, %s1171_s23   ;;  %s870_s22 = sphi %s919_s22, %s1170_s22   ;;  %s866_s21 = sphi %s917_s21, %s1169_s21  }
   0x4   : > { %s942_s27 = sadd.s32 1, %s878_s24   ;;  %s157_s28 = sadd.s32 1, %s874_s23 }
   0x5   : > { %s154_s29 = ssub.s32 %s878_s24, %s942_s27  ;;  %p167_p0 = scmp.ne.s32.totalorder %s874_s23, %s870_s22 }
   0x6   : > { %p155_p1 = scmp.eq.s32.totalorder %s154_s29, 0  ;;  %p168_p2 = scmp.eq.s32.totalorder %s938_s25, 1 }
   0x7   : > { %p173_p3 = scmp.ne.s32.totalorder %s870_s22, %s866_s21  ;;  %p174_p4 = scmp.eq.s32.totalorder %s681_s26, 1 }
   0x8   : > { %s953_s30 = scalar_select %p155_p1, %s874_s23, %s157_s28  }
   0x9   : > { %p955_p5 = por %p168_p2, %p167_p0  ;;  %p959_p6 = por %p174_p4, %p173_p3 }
   0xa   : > { %p684_p7 = scmp.ge.s32.totalorder %s878_s24, 1  ;;  %p216_p8 = scmp.lt.s32.totalorder %s878_s24, 3 }
   0xc   : > { %p217_p9 = pnand %p684_p7, %p216_p8 }
   0xd   : > { %s246_s11 = smul.u32 (!%p217_p9), 13, %s938_s25  ;;  %s243_s10 = sand.u32 (!%p217_p9), 1, %s870_s22  }
   0xe   : > { %220 = sbr.rel (%p217_p9) target bundleno = 403 (0x193), region = 44 }
   0xf   : > { %p247_p10 = scmp.lt.s32.totalorder (!%p217_p9), %s246_s11, 25  ;;  %s772_s13 = smul.u32 (!%p217_p9), 104, %s243_s10 }
  0x10   : > { %s763_s15 = smul.u32 (!%p217_p9), 104, %s938_s25  ;;  %s604_s25 = scalar_lea.sflag (!%p217_p9), [#allocation3], %s243_s10 }
  0x12   : > { %s615_s18 = scalar_lea.hbm (!%p217_p9), %s1166_s6, %s763_s15 }
  0x13   : > { %v752_v0 = vld [vmem:[%s1161_s1 + $0x8] sm:$0xff]  ;;  %v751_v1 = vld [vmem:[%s1161_s1] sm:$0xff]  ;;  %s1174_s11 = smov (!%p247_p10, %s246_s11), 25  ;;  %vm307_vm0 = vcmask 261120   ;;  %v760_v27 = vld [vmem:[%s1163_s3 + $0x38] sm:$0xff]  ;;  %s618_s20 = sshll.u32 %s615_s18, 4  ;;  %s619_s20 = int_to_ptr.hbm [resolvable:$true] %s618_s20 }
  0x14   : > { %335 = vmatpush.bf16.msra.mxu0 %v752_v0  ;;  %s685_s14 = sshll.u32 %s1174_s11, 3  ;;  %460 = vmatpush.bf16.msra.mxu1 %v760_v27  ;;  %v759_v28 = vld [vmem:[%s1163_s3 + $0x30] sm:$0xff]  ;;  %v758_v31 = vld [vmem:[%s1163_s3 + $0x28] sm:$0xff]  ;;  %v757_v34 = vld [vmem:[%s1163_s3 + $0x20] sm:$0xff]  ;;  %s830_s26 = sshra.s32 %s619_s20, 4  ;;  %s831_s26 = int_to_ptr.hbm [resolvable:$true] %s830_s26 }
  0x15   : > { %s975_s17 = scalar_lea.vmem %s1160_s0, %s685_s14  ;;  %764 = vmatpush.bf16.msra.mxu3 %v760_v27  ;;  %v756_v38 = vld [vmem:[%s1163_s3 + $0x18] sm:$0xff]  ;;  %v762_v39 = vld [vmem:[%s1165_s5 + $0x8] sm:$0xff]  ;;  %v755_v41 = vld [vmem:[%s1163_s3 + $0x10] sm:$0xff]  ;;  %s1099_s14 = scalar_lea.vmem [#allocation2], %s772_s13 }
  0x16   : > { %v978_v2 = vld [vmem:[%s975_s17] sm:$0xff]  ;;  %v981_v3 = vld [vmem:[%s975_s17 + $0x8] sm:$0xff]  ;;  %v987_v7 = vld [vmem:[%s975_s17 + $0x10] sm:$0xff]  ;;  %553 = vmatpush.bf16.msra.mxu2 %v762_v39  ;;  %s616_s19 = sshll.u32 %s1099_s14, 4  ;;  %s832_s28 = scalar_lea.hbm %s831_s26, 104  ;;  %s617_s19 = int_to_ptr.vmem [resolvable:$true] %s616_s19 }
  0x17   : > { %v267_v4 = vmax.f32 %v978_v2, 0.0  ;;  %v268_v5 = vmax.f32 %v981_v3, 0.0  ;;  %v990_v8 = vld [vmem:[%s975_s17 + $0x18] sm:$0xff]  ;;  %v269_v9 = vmax.f32 %v987_v7, 0.0  ;;  %v996_v12 = vld [vmem:[%s975_s17 + $0x20] sm:$0xff]  ;;  %v999_v13 = vld [vmem:[%s975_s17 + $0x28] sm:$0xff]  ;;  %v503_v43 = vpack.c.bf16 %v981_v3, %v978_v2  ;;  %p833_p11 = scmp.ne.s32.totalorder %s831_s26, %s832_s28  ;;  %p837_p0 = scmp.lt.s32.totalorder %s831_s26, %s1166_s6 }
  0x18   : > { %336 = vmatpush.bf16.msra.mxu0 %v751_v1  ;;  %v270_v10 = vmax.f32 %v990_v8, 0.0  ;;  %v271_v14 = vmax.f32 %v996_v12, 0.0  ;;  %v272_v15 = vmax.f32 %v999_v13, 0.0  ;;  %v1005_v17 = vld [vmem:[%s975_s17 + $0x30] sm:$0xff]  ;;  %v1008_v18 = vld [vmem:[%s975_s17 + $0x38] sm:$0xff]  ;;  %v1014_v22 = vld [vmem:[%s975_s17 + $0x40] sm:$0xff]  ;;  %461 = vmatpush.bf16.msra.mxu1 %v759_v28  ;;  %v504_v46 = vpack.c.bf16 %v990_v8, %v987_v7 }
  0x19   : > { %v280_v6 = vpack.c.bf16 %v268_v5, %v267_v4  ;;  %v273_v19 = vmax.f32 %v1005_v17, 0.0  ;;  %v274_v20 = vmax.f32 %v1008_v18, 0.0  ;;  %v1017_v23 = vld [vmem:[%s975_s17 + $0x48] sm:$0xff]  ;;  %v275_v24 = vmax.f32 %v1014_v22, 0.0  ;;  %v1029_v29 = vld [vmem:[%s975_s17 + $0x50] sm:$0xff]  ;;  %v1032_v30 = vld [vmem:[%s975_s17 + $0x58] sm:$0xff]  ;;  %765 = vmatpush.bf16.msra.mxu3 %v759_v28  ;;  %p834_p12 = pnand %p833_p11, %p955_p5 }
  0x1a   : > { %v281_v11 = vpack.c.bf16 %v270_v10, %v269_v9  ;;  %v282_v16 = vpack.c.bf16 %v272_v15, %v271_v14  ;;  %v276_v25 = vmax.f32 %v1017_v23, 0.0  ;;  %v277_v32 = vmax.f32 %v1029_v29, 0.0  ;;  %v1044_v36 = vld [vmem:[%s975_s17 + $0x60] sm:$0xff]  ;;  %v754_v44 = vld [vmem:[%s1163_s3 + $0x8] sm:$0xff]  ;;  %s836_s11 = scalar_lea.hbm %s1166_s6, 208 }
  0x1b   : > { %694 = vmatmul.msk.bf16.vlgmr.msra.gmra.mxu0 %vm307_vm0, %v280_v6  ;;  %v283_v21 = vpack.c.bf16 %v274_v20, %v273_v19  ;;  %v278_v33 = vmax.f32 %v1032_v30, 0.0  ;;  %v279_v37 = vmax.f32 %v1044_v36, 0.0  ;;  %v761_v42 = vld [vmem:[%s1165_s5] sm:$0xff]  ;;  %v505_v49 = vpack.c.bf16 %v999_v13, %v996_v12  ;;  %p835_p13 = pneg %p834_p12  ;;  %p838_p1 = scmp.lt.s32.totalorder %s836_s11, %s832_s28 }
  0x1c   : > { %v284_v26 = vpack.c.bf16 %v276_v25, %v275_v24  ;;  %462 = vmatpush.bf16.msra.mxu1 %v758_v31  ;;  %554 = vmatpush.bf16.msra.mxu2 %v761_v42  ;;  %v753_v45 = vld [vmem:[%s1163_s3] sm:$0xff]  ;;  %v506_v57 = vpack.c.bf16 %v1008_v18, %v1005_v17  ;;  %v507_v1 = vpack.c.bf16 %v1017_v23, %v1014_v22 }
  0x1d   : > { %766 = vmatpush.bf16.msra.mxu3 %v758_v31  ;;  %v285_v35 = vpack.c.bf16 %v278_v33, %v277_v32  ;;  %v286_v40 = vpack.c.bf16 %v279_v37, %v279_v37  ;;  %v814_v48 = vld [vmem:[%s1162_s2] ss:$0 sm:$0xff]  ;;  %v508_v9 = vpack.c.bf16 %v1032_v30, %v1029_v29  ;;  %v509_v17 = vpack.c.bf16 %v1044_v36, %v1044_v36  ;;  %p839_p2 = por %p838_p1, %p837_p0 }
  0x1f   : > { %741 = vmatmul.msk.bf16.vlgmr.msra.gmra.mxu2 %vm307_vm0, %v503_v43  ;;  %p840_p3 = pnand %p839_p2, %p835_p13 }
  0x20   : > { %463 = vmatpush.bf16.msra.mxu1 %v757_v34 }
  0x21   : > { %767 = vmatpush.bf16.msra.mxu3 %v757_v34 }
  0x24   : > { %464 = vmatpush.bf16.msra.mxu1 %v756_v38 }
  0x25   : > { %768 = vmatpush.bf16.msra.mxu3 %v756_v38 }
  0x28   : > { %465 = vmatpush.bf16.msra.mxu1 %v755_v41 }
  0x29   : > { %769 = vmatpush.bf16.msra.mxu3 %v755_v41 }
  0x2b   : > { %695 = vmatmul.msk.bf16.gmra.mxu0 %vm307_vm0, %v281_v11 }
  0x2c   : > { %466 = vmatpush.bf16.msra.mxu1 %v754_v44 }
  0x2d   : > { %770 = vmatpush.bf16.msra.mxu3 %v754_v44 }
  0x2f   : > { %742 = vmatmul.msk.bf16.gmra.mxu2 %vm307_vm0, %v504_v46 }
  0x30   : > { %467 = vmatpush.bf16.msra.mxu1 %v753_v45 }
  0x31   : > { %771 = vmatpush.bf16.msra.mxu3 %v753_v45 }
  0x3b   : > { %696 = vmatmul.msk.bf16.gmra.mxu0 %vm307_vm0, %v282_v16 }
  0x3f   : > { %743 = vmatmul.msk.bf16.gmra.mxu2 %vm307_vm0, %v505_v49 }
  0x4b   : > { %697 = vmatmul.msk.bf16.gmra.mxu0 %vm307_vm0, %v283_v21 }
  0x4f   : > { %744 = vmatmul.msk.bf16.gmra.mxu2 %vm307_vm0, %v506_v57 }
  0x5b   : > { %698 = vmatmul.msk.bf16.gmra.mxu0 %vm307_vm0, %v284_v26 }
  0x5f   : > { %745 = vmatmul.msk.bf16.gmra.mxu2 %vm307_vm0, %v507_v1 }
  0x6b   : > { %699 = vmatmul.msk.bf16.gmra.mxu0 %vm307_vm0, %v285_v35 }
  0x6f   : > { %746 = vmatmul.msk.bf16.gmra.mxu2 %vm307_vm0, %v508_v9 }
  0x7b   : > { %700 = vmatmul.msk.bf16.gmra.mxu0 %vm307_vm0, %v286_v40  ;;  %v1094_v40 = vld [vmem:[%s1164_s4] ss:$0 sm:$0xff] }
  0x7f   : > { %747 = vmatmul.msk.bf16.gmra.mxu2 %vm307_vm0, %v509_v17 }
  0x98   : > { %v338_v47 = vpop.f32.mrf.mxu0 }
  0x99   : > { %v339_v50 = vadd.f32 %v814_v48, %v338_v47 }
  0x9b   : > { %v372_v53 = vmax.f32 %v339_v50, 0.0 }
  0xa0   : > { %v340_v51 = vpop.f32.mrf.mxu0 }
  0xa1   : > { %v341_v52 = vadd.f32 %v814_v48, %v340_v51 }
  0xa2   : > { %v556_v35 = vpop.f32.mrf.mxu2 }
  0xa3   : > { %v373_v54 = vmax.f32 %v341_v52, 0.0 }
  0xa5   : > { %v385_v55 = vpack.c.bf16 %v373_v54, %v372_v53 }
  0xa7   : > { %468 = vmatmul.bf16.vlgmr.msra.gmra.mxu1 %v385_v55 }
  0xa8   : > { %v343_v56 = vpop.f32.mrf.mxu0 }
  0xa9   : > { %v344_v58 = vadd.f32 %v814_v48, %v343_v56 }
  0xaa   : > { %v558_v37 = vpop.f32.mrf.mxu2 }
  0xab   : > { %v374_v61 = vmax.f32 %v344_v58, 0.0 }
  0xb0   : > { %v345_v59 = vpop.f32.mrf.mxu0 }
  0xb1   : > { %v346_v60 = vadd.f32 %v814_v48, %v345_v59 }
  0xb2   : > { %v561_v38 = vpop.f32.mrf.mxu2 }
  0xb3   : > { %v375_v62 = vmax.f32 %v346_v60, 0.0 }
  0xb5   : > { %v386_v63 = vpack.c.bf16 %v375_v62, %v374_v61 }
  0xb7   : > { %473 = vmatmul.bf16.gmra.mxu1 %v386_v63 }
  0xb8   : > { %v348_v0 = vpop.f32.mrf.mxu0 }
  0xb9   : > { %v349_v2 = vadd.f32 %v814_v48, %v348_v0 }
  0xba   : > { %v563_v39 = vpop.f32.mrf.mxu2 }
  0xbb   : > { %v376_v5 = vmax.f32 %v349_v2, 0.0 }
  0xc0   : > { %v350_v3 = vpop.f32.mrf.mxu0 }
  0xc1   : > { %v351_v4 = vadd.f32 %v814_v48, %v350_v3 }
  0xc2   : > { %v566_v41 = vpop.f32.mrf.mxu2 }
  0xc3   : > { %v377_v6 = vmax.f32 %v351_v4, 0.0 }
  0xc5   : > { %v387_v7 = vpack.c.bf16 %v377_v6, %v376_v5 }
  0xc7   : > { %478 = vmatmul.bf16.gmra.mxu1 %v387_v7 }
  0xc8   : > { %v353_v8 = vpop.f32.mrf.mxu0 }
  0xc9   : > { %v354_v10 = vadd.f32 %v814_v48, %v353_v8 }
  0xca   : > { %v568_v45 = vpop.f32.mrf.mxu2 }
  0xcb   : > { %v378_v13 = vmax.f32 %v354_v10, 0.0 }
  0xd0   : > { %v355_v11 = vpop.f32.mrf.mxu0 }
  0xd1   : > { %v356_v12 = vadd.f32 %v814_v48, %v355_v11 }
  0xd2   : > { %v571_v49 = vpop.f32.mrf.mxu2 }
  0xd3   : > { %v379_v14 = vmax.f32 %v356_v12, 0.0 }
  0xd5   : > { %v388_v15 = vpack.c.bf16 %v379_v14, %v378_v13 }
  0xd7   : > { %483 = vmatmul.bf16.gmra.mxu1 %v388_v15 }
  0xd8   : > { %v358_v16 = vpop.f32.mrf.mxu0 }
  0xd9   : > { %v359_v18 = vadd.f32 %v814_v48, %v358_v16 }
  0xda   : > { %v573_v53 = vpop.f32.mrf.mxu2 }
  0xdb   : > { %v380_v21 = vmax.f32 %v359_v18, 0.0 }
  0xe0   : > { %v360_v19 = vpop.f32.mrf.mxu0 }
  0xe1   : > { %v361_v20 = vadd.f32 %v814_v48, %v360_v19 }
  0xe2   : > { %v576_v57 = vpop.f32.mrf.mxu2 }
  0xe3   : > { %v381_v22 = vmax.f32 %v361_v20, 0.0 }
  0xe5   : > { %v389_v23 = vpack.c.bf16 %v381_v22, %v380_v21 }
  0xe7   : > { %488 = vmatmul.bf16.gmra.mxu1 %v389_v23 }
  0xe8   : > { %v363_v24 = vpop.f32.mrf.mxu0 }
  0xe9   : > { %v364_v25 = vadd.f32 %v814_v48, %v363_v24 }
  0xea   : > { %v578_v61 = vpop.f32.mrf.mxu2 }
  0xeb   : > { %v382_v28 = vmax.f32 %v364_v25, 0.0 }
  0xf0   : > { %v365_v26 = vpop.f32.mrf.mxu0 }
  0xf1   : > { %v366_v27 = vadd.f32 %v814_v48, %v365_v26 }
  0xf2   : > { %v581_v1 = vpop.f32.mrf.mxu2 }
  0xf3   : > { %v383_v29 = vmax.f32 %v366_v27, 0.0 }
  0xf5   : > { %v390_v30 = vpack.c.bf16 %v383_v29, %v382_v28 }
  0xf7   : > { %493 = vmatmul.bf16.vlgmr.msra.gmra.mxu3 %v390_v30 }
  0xf8   : > { %v368_v31 = vpop.f32.mrf.mxu0 }
  0xf9   : > { %v369_v32 = vadd.f32 %v814_v48, %v368_v31 }
  0xfa   : > { %v583_v5 = vpop.f32.mrf.mxu2 }
  0xfb   : > { %v384_v33 = vmax.f32 %v369_v32, 0.0 }
  0xfd   : > { %v391_v36 = vpack.c.bf16 %v384_v33, %v384_v33 }
 0x100   : > { %v370_v34 = vpop.f32.mrf.mxu0 }
 0x102   : > { %v586_v9 = vpop.f32.mrf.mxu2 }
 0x107   : > { %498 = vmatmul.bf16.gmra.mxu3 %v391_v36 }
 0x10a   : > { %v588_v13 = vpop.f32.mrf.mxu2 }
 0x124   : > { %v469_v42 = vpop.f32.mrf.mxu1 }
 0x125   : > { %v470_v43 = vadd.f32 %v1094_v40, %v469_v42 }
 0x127   : > { %v557_v44 = vadd.f32 %v556_v35, %v470_v43 }
 0x129   : > { %590 = vst [vmem:[%s1099_s14] sm:$0xff] %v557_v44 }
 0x12c   : > { %v471_v46 = vpop.f32.mrf.mxu1 }
 0x12d   : > { %v472_v47 = vadd.f32 %v1094_v40, %v471_v46 }
 0x12f   : > { %v559_v48 = vadd.f32 %v558_v37, %v472_v47 }
 0x131   : > { %591 = vst [vmem:[%s1099_s14 + $0x8] sm:$0xff] %v559_v48 }
 0x134   : > { %v474_v50 = vpop.f32.mrf.mxu1 }
 0x135   : > { %v475_v51 = vadd.f32 %v1094_v40, %v474_v50 }
 0x137   : > { %v562_v52 = vadd.f32 %v561_v38, %v475_v51 }
 0x139   : > { %592 = vst [vmem:[%s1099_s14 + $0x10] sm:$0xff] %v562_v52 }
 0x13c   : > { %v476_v54 = vpop.f32.mrf.mxu1 }
 0x13d   : > { %v477_v55 = vadd.f32 %v1094_v40, %v476_v54 }
 0x13f   : > { %v564_v56 = vadd.f32 %v563_v39, %v477_v55 }
 0x141   : > { %593 = vst [vmem:[%s1099_s14 + $0x18] sm:$0xff] %v564_v56 }
 0x144   : > { %v479_v58 = vpop.f32.mrf.mxu1 }
 0x145   : > { %v480_v59 = vadd.f32 %v1094_v40, %v479_v58 }
 0x147   : > { %v567_v60 = vadd.f32 %v566_v41, %v480_v59 }
 0x149   : > { %594 = vst [vmem:[%s1099_s14 + $0x20] sm:$0xff] %v567_v60 }
 0x14c   : > { %v481_v62 = vpop.f32.mrf.mxu1 }
 0x14d   : > { %v482_v63 = vadd.f32 %v1094_v40, %v481_v62 }
 0x14f   : > { %v569_v0 = vadd.f32 %v568_v45, %v482_v63 }
 0x151   : > { %595 = vst [vmem:[%s1099_s14 + $0x28] sm:$0xff] %v569_v0 }
 0x154   : > { %v484_v2 = vpop.f32.mrf.mxu1 }
 0x155   : > { %v485_v3 = vadd.f32 %v1094_v40, %v484_v2 }
 0x157   : > { %v572_v4 = vadd.f32 %v571_v49, %v485_v3 }
 0x159   : > { %596 = vst [vmem:[%s1099_s14 + $0x30] sm:$0xff] %v572_v4 }
 0x15c   : > { %v486_v6 = vpop.f32.mrf.mxu1 }
 0x15d   : > { %v487_v7 = vadd.f32 %v1094_v40, %v486_v6 }
 0x15f   : > { %v574_v8 = vadd.f32 %v573_v53, %v487_v7 }
 0x161   : > { %597 = vst [vmem:[%s1099_s14 + $0x38] sm:$0xff] %v574_v8 }
 0x164   : > { %v489_v10 = vpop.f32.mrf.mxu1 }
 0x165   : > { %v490_v11 = vadd.f32 %v1094_v40, %v489_v10 }
 0x167   : > { %v577_v12 = vadd.f32 %v576_v57, %v490_v11 }
 0x169   : > { %598 = vst [vmem:[%s1099_s14 + $0x40] sm:$0xff] %v577_v12 }
 0x16c   : > { %v491_v14 = vpop.f32.mrf.mxu1 }
 0x16d   : > { %v492_v15 = vadd.f32 %v1094_v40, %v491_v14 }
 0x16f   : > { %v579_v16 = vadd.f32 %v578_v61, %v492_v15 }
 0x171   : > { %599 = vst [vmem:[%s1099_s14 + $0x48] sm:$0xff] %v579_v16 }
 0x17a   : > { %v494_v17 = vpop.f32.mrf.mxu3 }
 0x17b   : > { %v495_v18 = vadd.f32 %v1094_v40, %v494_v17 }
 0x17d   : > { %v582_v19 = vadd.f32 %v581_v1, %v495_v18 }
 0x17f   : > { %600 = vst [vmem:[%s1099_s14 + $0x50] sm:$0xff] %v582_v19 }
 0x182   : > { %v496_v20 = vpop.f32.mrf.mxu3 }
 0x183   : > { %v497_v21 = vadd.f32 %v1094_v40, %v496_v20 }
 0x185   : > { %v584_v22 = vadd.f32 %v583_v5, %v497_v21 }
 0x187   : > { %601 = vst [vmem:[%s1099_s14 + $0x58] sm:$0xff] %v584_v22 }
 0x18a   : > { %v499_v23 = vpop.f32.mrf.mxu3 }
 0x18b   : > { %v500_v24 = vadd.f32 %v1094_v40, %v499_v23 }
 0x18d   : > { %v587_v25 = vadd.f32 %v586_v9, %v500_v24 }
 0x18f   : > { %602 = vst [vmem:[%s1099_s14 + $0x60] sm:$0xff] %v587_v25 }
 0x190   : > { %843 = shalt.err (!%p840_p3)
}
 0x191   : > { %s880_s10 = smov 128   ;;  %s881_s14 = smov 8  }
 0x192   : > { %773 = dma.vmem_to_hbm [thread:$0]  (%p955_p5), %s617_s19, 1664, %s619_s20, %s604_s25, %s880_s10, %s880_s10, %s881_s14   ;;  %v501_v26 = vpop.f32.mrf.mxu3 }
 0x193 PF: > { %p779_p4 = scmp.ge.s32.totalorder %s878_s24, 2  ;;  %s633_s15 = sand.u32 1, %s866_s21  }
 0x194   : > { %s634_s16 = scalar_lea.sflag [#allocation3], %s633_s15 }
 0x195   : > { %p776_p7 = pnand %p779_p4, %p959_p6 }
 0x197   : > { %p777_p8 = pneg %p776_p7 }
 0x199   : > { %861 = dma.done.wait (%p777_p8), %s634_s16, 1664  }
 0x19a   : > { %863 = vsyncadd (%p777_p8), %s634_s16, 4294965632  ;;  %p16_p9 = scmp.ge.s32.totalorder %s942_s27, 4   ;;  %s1169_s21 = smov %s870_s22 }
 0x19b   : > { %s1170_s22 = smov %s874_s23  ;;  %s1171_s23 = smov %s953_s30 }
 0x19c   : > { %s1172_s24 = smov %s942_s27  ;;  %18 = sbr.rel (!%p16_p9) target bundleno = 3 (0x3), region = 79 }
 0x1a1   :  { %640 = vsyncpa [#allocation3], 1 }
 0x1a2   :  { %642 = vsyncpa [#allocation3 + $0x1], 1 }

</bundles_post_ra>
